<compile_context>
chip_gen: v6e
topology: v6e:2x2x1
jax: 0.10.0
libtpu: 0.0.40
codegen_flags: <defaults>
</compile_context>

<pallas_src>
import jax
import jax.numpy as jnp
from jax.experimental import pallas as pl
from jax.experimental.pallas import tpu as pltpu


def _round_up(n: int, m: int) -> int:
    return ((n + m - 1) // m) * m


# Stay within v7x's 32 MiB default scoped VMEM (64 MiB physical) for the
# "weights fully resident" path; above this, switch to the H-tiled kernel.
_RESIDENT_BUDGET_BYTES = 24 * 1024 * 1024


# --------------------------------------------------------------------------
# Kernels
# --------------------------------------------------------------------------
def _mlp_kernel_fused(x_ref, w1_ref, b1_ref, w2_ref, b2_ref, out_ref):
    """Whole-weight-resident path: one batch tile per grid step."""
    # bf16 cast in-kernel (free VPU op) -> no padded bf16 x copy in HBM.
    x = x_ref[...].astype(jnp.bfloat16)
    # fc1 on the MXU with f32 accumulation.
    h = jnp.dot(x, w1_ref[...], preferred_element_type=jnp.float32)
    # bias + ReLU in f32 on the VPU.  Dropout(0.5) -> identity (eval mode).
    h = jnp.maximum(h + b1_ref[...], 0.0)
    # fc2 on the MXU.
    o = jnp.dot(h.astype(jnp.bfloat16), w2_ref[...],
                preferred_element_type=jnp.float32)
    out_ref[...] = (o + b2_ref[...]).astype(out_ref.dtype)


def _mlp_kernel_htiled(x_ref, w1_ref, b1_ref, w2_ref, b2_ref, out_ref, acc_ref):
    """Hidden-dim tiled path (P3): grid=(batch_tiles, hidden_tiles)."""
    hi = pl.program_id(1)

    @pl.when(hi == 0)
    def _():
        acc_ref[...] = jnp.zeros_like(acc_ref)

    x = x_ref[...].astype(jnp.bfloat16)
    h = jnp.dot(x, w1_ref[...], preferred_element_type=jnp.float32)
    h = jnp.maximum(h + b1_ref[...], 0.0)          # ReLU is per-hidden-unit -> exact under H tiling
    acc_ref[...] += jnp.dot(h.astype(jnp.bfloat16), w2_ref[...],
                            preferred_element_type=jnp.float32)

    @pl.when(hi == pl.num_programs(1) - 1)
    def _():
        out_ref[...] = (acc_ref[...] + b2_ref[...]).astype(out_ref.dtype)


# --------------------------------------------------------------------------
# One-time parameter preparation (hoisted out of the forward pass)
# --------------------------------------------------------------------------
def prepare_params(w1, b1, w2, b2):
    """Pad the hidden dim to a lane-dense multiple of 128 and cast weights to
    bf16 once.  w1:[D,H], b1:[H], w2:[H,C], b2:[C] (f32, [in,out] layout)."""
    D, H = w1.shape
    C = w2.shape[1]
    Hp = _round_up(H, 128)
    w1p = jnp.zeros((D, Hp), jnp.bfloat16).at[:, :H].set(w1.astype(jnp.bfloat16))
    b1p = jnp.zeros((1, Hp), jnp.float32).at[:, :H].set(
        jnp.reshape(b1, (1, H)).astype(jnp.float32))
    w2p = jnp.zeros((Hp, C), jnp.bfloat16).at[:H, :].set(w2.astype(jnp.bfloat16))
    b2p = jnp.reshape(b2, (1, C)).astype(jnp.float32)
    # Padded hidden units get bias 0 -> ReLU(0)=0 -> contribute nothing to fc2.
    return w1p, b1p, w2p, b2p


def _pick_tb(B: int) -> int:
    # Big tiles amortize the ~0.35us per-grid-step overhead; keep >=4 steps
    # where possible (>=2 per TensorCore on v7x so the DMA pipeline overlaps).
    for cand in (1024, 512, 256, 128, 64, 32, 16, 8):
        if B >= 4 * cand:
            return cand
    return 8


# --------------------------------------------------------------------------
# Forward pass
# --------------------------------------------------------------------------
def mlp_forward(x, params, *, tb=None, force_h_tiling=False, hidden_tile=None):
    """x: [B, D] f32; params = prepare_params(...).  Returns [B, C] f32."""
    w1p, b1p, w2p, b2p = params
    B, D = x.shape
    assert w1p.shape[0] == D
    Hp = w1p.shape[1]
    C = w2p.shape[1]

    if tb is None:
        tb = _pick_tb(B)
    tb = max(8, _round_up(tb, 8))
    Bp = _round_up(B, tb)
    x = x.astype(jnp.float32)
    if Bp != B:
        x = jnp.pad(x, ((0, Bp - B), (0, 0)))
    n_bt = Bp // tb

    # VMEM footprint estimates (double-buffered x/out tiles + intermediates).
    weight_bytes = w1p.size * 2 + w2p.size * 2 + b1p.size * 4 + b2p.size * 4
    io_bytes = 2 * tb * D * 4 + 2 * tb * C * 4
    inter_bytes = 3 * tb * Hp * 4
    simple_bytes = 2 * weight_bytes + io_bytes + inter_bytes

    use_h_tiling = force_h_tiling or (simple_bytes > _RESIDENT_BUDGET_BYTES)

    if not use_h_tiling:
        vlim = int(min(64 << 20, max(8 << 20, 2 * simple_bytes)))

        def run(single_buffer_weights: bool):
            def wspec(shape):
                if single_buffer_weights:
                    # Constant blocks: one VMEM buffer instead of two.
                    return pl.BlockSpec(shape, lambda i: (0, 0),
                                        pipeline_mode=pl.Buffered(1))
                return pl.BlockSpec(shape, lambda i: (0, 0))

            return pl.pallas_call(
                _mlp_kernel_fused,
                out_shape=jax.ShapeDtypeStruct((Bp, C), jnp.float32),
                grid_spec=pltpu.PrefetchScalarGridSpec(
                    num_scalar_prefetch=0,
                    grid=(n_bt,),
                    in_specs=[
                        # x tile streams over the batch axis (unpadded D).
                        pl.BlockSpec((tb, D), lambda i: (i, 0)),
                        wspec((D, Hp)),     # w1 (bf16), VMEM-resident
                        wspec((1, Hp)),     # b1 (f32)
                        wspec((Hp, C)),     # w2 (bf16)
                        wspec((1, C)),      # b2 (f32)
                    ],
                    out_specs=pl.BlockSpec((tb, C), lambda i: (i, 0)),
                ),
                compiler_params=pltpu.CompilerParams(
                    dimension_semantics=("parallel",),
                    vmem_limit_bytes=vlim,
                ),
            )(x, w1p, b1p, w2p, b2p)

        try:
            out_p = run(single_buffer_weights=True)
        except Exception:
            # Fallback if single-buffered pipeline_mode is unsupported here.
            out_p = run(single_buffer_weights=False)
    else:
        # Hidden-dim tile: largest of {512,384,256,128} dividing Hp.
        if hidden_tile is None:
            th = 128
            for cand in (512, 384, 256, 128):
                if Hp % cand == 0:
                    th = cand
                    break
        else:
            th = hidden_tile
        assert Hp % th == 0 and th % 128 == 0
        n_ht = Hp // th
        tiled_bytes = (2 * (D * th * 2 + th * 4 + th * C * 2) + C * 4
                       + io_bytes + 3 * tb * th * 4 + tb * C * 4)
        vlim = int(min(64 << 20, max(8 << 20, 2 * tiled_bytes)))

        out_p = pl.pallas_call(
            _mlp_kernel_htiled,
            out_shape=jax.ShapeDtypeStruct((Bp, C), jnp.float32),
            grid_spec=pltpu.PrefetchScalarGridSpec(
                num_scalar_prefetch=0,
                grid=(n_bt, n_ht),
                in_specs=[
                    pl.BlockSpec((tb, D), lambda i, h: (i, 0)),
                    pl.BlockSpec((D, th), lambda i, h: (0, h)),
                    pl.BlockSpec((1, th), lambda i, h: (0, h)),
                    pl.BlockSpec((th, C), lambda i, h: (h, 0)),
                    pl.BlockSpec((1, C), lambda i, h: (0, 0)),
                ],
                out_specs=pl.BlockSpec((tb, C), lambda i, h: (i, 0)),
                scratch_shapes=[pltpu.VMEM((tb, C), jnp.float32)],
            ),
            compiler_params=pltpu.CompilerParams(
                dimension_semantics=("parallel", "arbitrary"),
                vmem_limit_bytes=vlim,
            ),
        )(x, w1p, b1p, w2p, b2p)

    if Bp != B:
        out_p = out_p[:B]
    return out_p


def init_params(key, input_dim, hidden_dim, num_classes):
    """Deterministic init mimicking nn.Linear's uniform(-1/sqrt(fan_in))."""
    k1, k2, k3, k4 = jax.random.split(key, 4)
    lim1 = 1.0 / (input_dim ** 0.5)
    lim2 = 1.0 / (hidden_dim ** 0.5)
    # Stored pre-transposed: [in, out].
    w1 = jax.random.uniform(k1, (input_dim, hidden_dim), jnp.float32, -lim1, lim1)
    b1 = jax.random.uniform(k2, (hidden_dim,), jnp.float32, -lim1, lim1)
    w2 = jax.random.uniform(k3, (hidden_dim, num_classes), jnp.float32, -lim2, lim2)
    b2 = jax.random.uniform(k4, (num_classes,), jnp.float32, -lim2, lim2)
    return w1, b1, w2, b2


if __name__ == "__main__":
    batch = 256          # several batch tiles so the pipeline actually streams
    input_dim = 64
    hidden_dim = 200     # not a multiple of 128 -> exercises hidden-dim padding
    num_classes = 10

    key = jax.random.PRNGKey(0)
    kx, kp = jax.random.split(key)
    x = jax.random.normal(kx, (batch, input_dim), jnp.float32)
    w1, b1, w2, b2 = init_params(kp, input_dim, hidden_dim, num_classes)

    # One-time parameter pad/cast (hoisted out of the forward pass).
    params = prepare_params(w1, b1, w2, b2)

    # Fused, weights-resident path.
    out = jax.block_until_ready(mlp_forward(x, params))
    # Also exercise the H-tiled accumulator path (used for large weights / v7x).
    out_tiled = jax.block_until_ready(
        mlp_forward(x, params, force_h_tiling=True, hidden_tile=128))

    # Pure-f32 reference (eval-mode semantics).  bf16 MXU operands with f32
    # accumulation -> slightly looser tolerance than pure-f32.
    ref = jnp.maximum(x @ w1 + b1, 0.0) @ w2 + b2
    assert out.shape == (batch, num_classes)
    assert out_tiled.shape == (batch, num_classes)
    assert jnp.allclose(out, ref, atol=3e-2, rtol=3e-2), (
        float(jnp.max(jnp.abs(out - ref))))
    assert jnp.allclose(out_tiled, ref, atol=3e-2, rtol=3e-2), (
        float(jnp.max(jnp.abs(out_tiled - ref))))

    print("KERNEL_OK")
</pallas_src>

<mosaic_0001>
module attributes {stable_mosaic.version = 11 : i64} {
  func.func @_mlp_kernel_fused(%arg0: i32, %arg1: memref<64x64xf32, #tpu.memory_space<vmem>>, %arg2: memref<64x256xbf16, #tpu.memory_space<vmem>>, %arg3: memref<1x256xf32, #tpu.memory_space<vmem>>, %arg4: memref<256x10xbf16, #tpu.memory_space<vmem>>, %arg5: memref<1x10xf32, #tpu.memory_space<vmem>>, %arg6: memref<64x10xf32, #tpu.memory_space<vmem>>) attributes {dimension_semantics = [#tpu.dimension_semantics<parallel>], iteration_bounds = array<i64: 4>, scalar_prefetch = 0 : i64, scratch_operands = 0 : i64, tpu.core_type = #tpu.core_type<tc>, window_params = [{transform_indices = @transform_0, window_bounds = array<i64: 64, 64>}, {pipeline_mode = #tpu.pipeline_mode<synchronous>, transform_indices = @transform_1, window_bounds = array<i64: 64, 256>}, {pipeline_mode = #tpu.pipeline_mode<synchronous>, transform_indices = @transform_2, window_bounds = array<i64: 1, 256>}, {pipeline_mode = #tpu.pipeline_mode<synchronous>, transform_indices = @transform_3, window_bounds = array<i64: 256, 10>}, {pipeline_mode = #tpu.pipeline_mode<synchronous>, transform_indices = @transform_4, window_bounds = array<i64: 1, 10>}, {transform_indices = @transform_5, window_bounds = array<i64: 64, 10>}]} {
    %c0 = arith.constant 0 : index
    %c0_0 = arith.constant 0 : index
    %0 = vector.load %arg1[%c0, %c0_0] : memref<64x64xf32, #tpu.memory_space<vmem>>, vector<64x64xf32>
    %1 = arith.truncf %0 : vector<64x64xf32> to vector<64x64xbf16>
    %c0_1 = arith.constant 0 : index
    %c0_2 = arith.constant 0 : index
    %2 = vector.load %arg2[%c0_1, %c0_2] : memref<64x256xbf16, #tpu.memory_space<vmem>>, vector<64x256xbf16>
    %cst = arith.constant dense<0.000000e+00> : vector<64x256xf32>
    %3 = tpu.matmul %1, %2, %cst {dimension_numbers = #tpu.dot_dimension_numbers<[1], [0], [0], [1], [0, 0, 1, 1], [], []>} : vector<64x64xbf16>, vector<64x256xbf16>, vector<64x256xf32> -> vector<64x256xf32>
    %c0_3 = arith.constant 0 : index
    %c0_4 = arith.constant 0 : index
    %4 = vector.load %arg3[%c0_3, %c0_4] : memref<1x256xf32, #tpu.memory_space<vmem>>, vector<1x256xf32>
    %5 = vector.broadcast %4 : vector<1x256xf32> to vector<64x256xf32>
    %6 = arith.addf %3, %5 : vector<64x256xf32>
    %cst_5 = arith.constant 0.000000e+00 : f32
    %7 = vector.broadcast %cst_5 : f32 to vector<64x256xf32>
    %8 = arith.maximumf %6, %7 : vector<64x256xf32>
    %9 = arith.truncf %8 : vector<64x256xf32> to vector<64x256xbf16>
    %c0_6 = arith.constant 0 : index
    %c0_7 = arith.constant 0 : index
    %10 = vector.load %arg4[%c0_6, %c0_7] : memref<256x10xbf16, #tpu.memory_space<vmem>>, vector<256x10xbf16>
    %cst_8 = arith.constant dense<0.000000e+00> : vector<64x10xf32>
    %11 = tpu.matmul %9, %10, %cst_8 {dimension_numbers = #tpu.dot_dimension_numbers<[1], [0], [0], [1], [0, 0, 1, 1], [], []>} : vector<64x256xbf16>, vector<256x10xbf16>, vector<64x10xf32> -> vector<64x10xf32>
    %c0_9 = arith.constant 0 : index
    %c0_10 = arith.constant 0 : index
    %12 = vector.load %arg5[%c0_9, %c0_10] : memref<1x10xf32, #tpu.memory_space<vmem>>, vector<1x10xf32>
    %13 = vector.broadcast %12 : vector<1x10xf32> to vector<64x10xf32>
    %14 = arith.addf %11, %13 : vector<64x10xf32>
    %c0_11 = arith.constant 0 : index
    %c0_12 = arith.constant 0 : index
    %15 = vector.load %arg6[%c0_11, %c0_12] : memref<64x10xf32, #tpu.memory_space<vmem>>, vector<64x10xf32>
    tpu.vector_store %arg6[%c0_11, %c0_12], %14 {strides = array<i32>} : memref<64x10xf32, #tpu.memory_space<vmem>>, vector<64x10xf32>,
    return
  }
  func.func @transform_0(%arg0: i32) -> (i32, i32) {
    %c0_i32 = arith.constant 0 : i32
    %c0_i32_0 = arith.constant 0 : i32
    return %arg0, %c0_i32 : i32, i32
  }
  func.func @transform_1(%arg0: i32) -> (i32, i32) {
    %c0_i32 = arith.constant 0 : i32
    %c0_i32_0 = arith.constant 0 : i32
    %c0_i32_1 = arith.constant 0 : i32
    return %c0_i32, %c0_i32_0 : i32, i32
  }
  func.func @transform_2(%arg0: i32) -> (i32, i32) {
    %c0_i32 = arith.constant 0 : i32
    %c0_i32_0 = arith.constant 0 : i32
    %c0_i32_1 = arith.constant 0 : i32
    return %c0_i32, %c0_i32_0 : i32, i32
  }
  func.func @transform_3(%arg0: i32) -> (i32, i32) {
    %c0_i32 = arith.constant 0 : i32
    %c0_i32_0 = arith.constant 0 : i32
    %c0_i32_1 = arith.constant 0 : i32
    return %c0_i32, %c0_i32_0 : i32, i32
  }
  func.func @transform_4(%arg0: i32) -> (i32, i32) {
    %c0_i32 = arith.constant 0 : i32
    %c0_i32_0 = arith.constant 0 : i32
    %c0_i32_1 = arith.constant 0 : i32
    return %c0_i32, %c0_i32_0 : i32, i32
  }
  func.func @transform_5(%arg0: i32) -> (i32, i32) {
    %c0_i32 = arith.constant 0 : i32
    %c0_i32_0 = arith.constant 0 : i32
    return %arg0, %c0_i32 : i32, i32
  }
}

module attributes {stable_mosaic.version = 11 : i64} {
  func.func @_mlp_kernel_fused(%arg0: i32, %arg1: memref<64x64xf32, #tpu.memory_space<vmem>>, %arg2: memref<64x256xbf16, #tpu.memory_space<vmem>>, %arg3: memref<1x256xf32, #tpu.memory_space<vmem>>, %arg4: memref<256x10xbf16, #tpu.memory_space<vmem>>, %arg5: memref<1x10xf32, #tpu.memory_space<vmem>>, %arg6: memref<64x10xf32, #tpu.memory_space<vmem>>) attributes {dimension_semantics = [#tpu.dimension_semantics<parallel>], iteration_bounds = array<i64: 4>, scalar_prefetch = 0 : i64, scratch_operands = 0 : i64, tpu.core_type = #tpu.core_type<tc>, window_params = [{transform_indices = @transform_0, window_bounds = array<i64: 64, 64>}, {pipeline_mode = #tpu.pipeline_mode<synchronous>, transform_indices = @transform_1, window_bounds = array<i64: 64, 256>}, {pipeline_mode = #tpu.pipeline_mode<synchronous>, transform_indices = @transform_2, window_bounds = array<i64: 1, 256>}, {pipeline_mode = #tpu.pipeline_mode<synchronous>, transform_indices = @transform_3, window_bounds = array<i64: 256, 10>}, {pipeline_mode = #tpu.pipeline_mode<synchronous>, transform_indices = @transform_4, window_bounds = array<i64: 1, 10>}, {transform_indices = @transform_5, window_bounds = array<i64: 64, 10>}]} {
    %c0 = arith.constant 0 : index
    %c0_0 = arith.constant 0 : index
    %0 = vector.load %arg1[%c0, %c0_0] : memref<64x64xf32, #tpu.memory_space<vmem>>, vector<64x64xf32>
    %1 = arith.truncf %0 : vector<64x64xf32> to vector<64x64xbf16>
    %c0_1 = arith.constant 0 : index
    %c0_2 = arith.constant 0 : index
    %2 = vector.load %arg2[%c0_1, %c0_2] : memref<64x256xbf16, #tpu.memory_space<vmem>>, vector<64x256xbf16>
    %cst = arith.constant dense<0.000000e+00> : vector<64x256xf32>
    %3 = tpu.matmul %1, %2, %cst {dimension_numbers = #tpu.dot_dimension_numbers<[1], [0], [0], [1], [0, 0, 1, 1], [], []>} : vector<64x64xbf16>, vector<64x256xbf16>, vector<64x256xf32> -> vector<64x256xf32>
    %c0_3 = arith.constant 0 : index
    %c0_4 = arith.constant 0 : index
    %4 = vector.load %arg3[%c0_3, %c0_4] : memref<1x256xf32, #tpu.memory_space<vmem>>, vector<1x256xf32>
    %5 = vector.broadcast %4 : vector<1x256xf32> to vector<64x256xf32>
    %6 = arith.addf %3, %5 : vector<64x256xf32>
    %cst_5 = arith.constant 0.000000e+00 : f32
    %7 = vector.broadcast %cst_5 : f32 to vector<64x256xf32>
    %8 = arith.maximumf %6, %7 : vector<64x256xf32>
    %9 = arith.truncf %8 : vector<64x256xf32> to vector<64x256xbf16>
    %c0_6 = arith.constant 0 : index
    %c0_7 = arith.constant 0 : index
    %10 = vector.load %arg4[%c0_6, %c0_7] : memref<256x10xbf16, #tpu.memory_space<vmem>>, vector<256x10xbf16>
    %cst_8 = arith.constant dense<0.000000e+00> : vector<64x10xf32>
    %11 = tpu.matmul %9, %10, %cst_8 {dimension_numbers = #tpu.dot_dimension_numbers<[1], [0], [0], [1], [0, 0, 1, 1], [], []>} : vector<64x256xbf16>, vector<256x10xbf16>, vector<64x10xf32> -> vector<64x10xf32>
    %c0_9 = arith.constant 0 : index
    %c0_10 = arith.constant 0 : index
    %12 = vector.load %arg5[%c0_9, %c0_10] : memref<1x10xf32, #tpu.memory_space<vmem>>, vector<1x10xf32>
    %13 = vector.broadcast %12 : vector<1x10xf32> to vector<64x10xf32>
    %14 = arith.addf %11, %13 : vector<64x10xf32>
    %c0_11 = arith.constant 0 : index
    %c0_12 = arith.constant 0 : index
    %15 = vector.load %arg6[%c0_11, %c0_12] : memref<64x10xf32, #tpu.memory_space<vmem>>, vector<64x10xf32>
    tpu.vector_store %arg6[%c0_11, %c0_12], %14 {strides = array<i32>} : memref<64x10xf32, #tpu.memory_space<vmem>>, vector<64x10xf32>,
    return
  }
  func.func @transform_0(%arg0: i32) -> (i32, i32) {
    %c0_i32 = arith.constant 0 : i32
    %c0_i32_0 = arith.constant 0 : i32
    return %arg0, %c0_i32 : i32, i32
  }
  func.func @transform_1(%arg0: i32) -> (i32, i32) {
    %c0_i32 = arith.constant 0 : i32
    %c0_i32_0 = arith.constant 0 : i32
    %c0_i32_1 = arith.constant 0 : i32
    return %c0_i32, %c0_i32_0 : i32, i32
  }
  func.func @transform_2(%arg0: i32) -> (i32, i32) {
    %c0_i32 = arith.constant 0 : i32
    %c0_i32_0 = arith.constant 0 : i32
    %c0_i32_1 = arith.constant 0 : i32
    return %c0_i32, %c0_i32_0 : i32, i32
  }
  func.func @transform_3(%arg0: i32) -> (i32, i32) {
    %c0_i32 = arith.constant 0 : i32
    %c0_i32_0 = arith.constant 0 : i32
    %c0_i32_1 = arith.constant 0 : i32
    return %c0_i32, %c0_i32_0 : i32, i32
  }
  func.func @transform_4(%arg0: i32) -> (i32, i32) {
    %c0_i32 = arith.constant 0 : i32
    %c0_i32_0 = arith.constant 0 : i32
    %c0_i32_1 = arith.constant 0 : i32
    return %c0_i32, %c0_i32_0 : i32, i32
  }
  func.func @transform_5(%arg0: i32) -> (i32, i32) {
    %c0_i32 = arith.constant 0 : i32
    %c0_i32_0 = arith.constant 0 : i32
    return %arg0, %c0_i32 : i32, i32
  }
}

</mosaic_0001>

<bundles_post_ra>
// kernel: tpu_custom_call.1
= control target key start
LH: loop header
LB: loop body
LE: loop exit
PB: predicated region body
PF: predicated region fallthrough
CT: control target
= control target key end

     0   :  { %s848_s18 = smov 0   ;;  %s986_s0 = inlined_call_operand.vmem [shape: f32[256,64], index: 0, kind: input, shape index: {}]   ;;  %s987_s1 = inlined_call_operand.vmem [shape: bf16[64,256], index: 1, kind: input, shape index: {}]   ;;  %s988_s2 = inlined_call_operand.vmem [shape: f32[1,256], index: 2, kind: input, shape index: {}]   ;;  %s989_s3 = inlined_call_operand.vmem [shape: bf16[256,10], index: 3, kind: input, shape index: {}]   ;;  %s990_s4 = inlined_call_operand.vmem [shape: f32[1,10], index: 4, kind: input, shape index: {}]   ;;  %s991_s5 = inlined_call_operand.vmem [shape: f32[256,10], index: 5, kind: output, shape index: {}]  }
   0x1 LB: > { %s676_s19 = sadd.s32 4294967295, %s815_s18   ;;  %p680_p0 = scmp.ge.s32.totalorder %s815_s18, 1  ;;  %s815_s18 = sphi %s848_s18, %s15_s18  }
   0x2   : > { %p188_p1 = scmp.lt.s32.totalorder %s815_s18, 5 }
   0x4   : > { %p189_p2 = pnand %p680_p0, %p188_p1 }
   0x5   : > { %s681_s22 = sshll.u32 (!%p189_p2), %s676_s19, 3 }
   0x6   : > { %192 = sbr.rel (%p189_p2) target bundleno = 462 (0x1ce), region = 40  ;;  %p217_p3 = scmp.lt.s32.totalorder (!%p189_p2), %s681_s22, 31 }
   0xb   : > { %v781_v0 = vld [vmem:[%s987_s1 + $0x34] ss:$8 sps:$4 sm:$0xff]   ;;  %v783_v1 = vld [vmem:[%s987_s1 + $0x30] ss:$8 sps:$4 sm:$0xff]   ;;  %v817_v2 = vmov 0   ;;  %s993_s22 = smov (!%p217_p3, %s681_s22), 31  ;;  %v251_v37 = vlaneseq }
   0xc   : > { %346 = vmatprep.mubr.bf16.mxu0 %v817_v2  ;;  %322 = vmatprep.subr.bf16.mxu0 %v781_v0  ;;  %v784_v3 = vld [vmem:[%s987_s1 + $0x24] ss:$8 sps:$4 sm:$0xff]   ;;  %v786_v4 = vld [vmem:[%s987_s1 + $0x20] ss:$8 sps:$4 sm:$0xff]   ;;  %v787_v5 = vld [vmem:[%s987_s1 + $0x14] ss:$8 sps:$4 sm:$0xff]  }
   0xd   : > { %323 = vmatpush1.bf16.msra.mxu0 %v783_v1  ;;  %s682_s6 = sshll.u32 %s993_s22, 3  ;;  %v793_v6 = vld [vmem:[%s989_s3 + $0x78] sm:$0xff]   ;;  %v790_v8 = vld [vmem:[%s987_s1 + $0x4] ss:$8 sps:$4 sm:$0xff]   ;;  %v792_v9 = vld [vmem:[%s987_s1] ss:$8 sps:$4 sm:$0xff]  }
   0xe   : > { %324 = vmatprep.subr.bf16.mxu0 %v784_v3  ;;  %s883_s11 = scalar_lea.vmem %s986_s0, %s682_s6  ;;  %v789_v7 = vld [vmem:[%s987_s1 + $0x10] ss:$8 sps:$4 sm:$0xff]   ;;  %756 = vmatprep.subr.bf16.mxu1 %v793_v6  ;;  %v797_v16 = vld [vmem:[%s989_s3 + $0x68] sm:$0xff]   ;;  %vm301_vm0 = vcmask 523264   ;;  %v799_v20 = vld [vmem:[%s989_s3 + $0x60] sm:$0xff]   ;;  %v252_v38 = vshrl.u32 %v251_v37, 7  ;;  %s965_s10 = scalar_lea.vmem %s991_s5, %s682_s6 }
   0xf   : > { %v229_v10 = vld [vmem:[%s883_s11] sm:$0xff]  ;;  %v794_v11 = vld [vmem:[%s989_s3 + $0x38] sm:$0xff]   ;;  %v795_v12 = vld [vmem:[%s989_s3 + $0x70] sm:$0xff]   ;;  %vm611_vm1 = vcmask 80896  }
  0x10   : > { %v230_v13 = vld [vmem:[%s883_s11 + $0x8] sm:$0xff]  ;;  %764 = vmatpush3.bf16.msra.mxu1 %v794_v11  ;;  %v796_v14 = vld [vmem:[%s989_s3 + $0x30] sm:$0xff]   ;;  %v232_v18 = vld [vmem:[%s883_s11 + $0x18] sm:$0xff]  ;;  %v257_v39 = vsub.s32 1, %v252_v38  ;;  %v253_v40 = vsub.s32 0, %v252_v38 }
  0x11   : > { %325 = vmatpush1.bf16.msra.mxu0 %v786_v4  ;;  %757 = vmatprep.subr.bf16.mxu1 %v795_v12  ;;  %v237_v15 = vpack.c.bf16 %v230_v13, %v229_v10  ;;  %v231_v17 = vld [vmem:[%s883_s11 + $0x10] sm:$0xff]  ;;  %v798_v19 = vld [vmem:[%s989_s3 + $0x28] sm:$0xff]   ;;  %v800_v22 = vld [vmem:[%s989_s3 + $0x20] sm:$0xff]  }
  0x12   : > { %326 = vmatprep.subr.bf16.mxu0 %v787_v5  ;;  %v238_v21 = vpack.c.bf16 %v232_v18, %v231_v17  ;;  %v801_v23 = vld [vmem:[%s989_s3 + $0x58] sm:$0xff]   ;;  %v233_v25 = vld [vmem:[%s883_s11 + $0x20] sm:$0xff]  ;;  %v234_v26 = vld [vmem:[%s883_s11 + $0x28] sm:$0xff] }
  0x13   : > { %v802_v24 = vld [vmem:[%s989_s3 + $0x18] sm:$0xff]   ;;  %v239_v27 = vpack.c.bf16 %v234_v26, %v233_v25  ;;  %v235_v28 = vld [vmem:[%s883_s11 + $0x30] sm:$0xff]  ;;  %v805_v33 = vld [vmem:[%s989_s3 + $0x48] sm:$0xff]  }
  0x14   : > { %765 = vmatpush3.bf16.msra.mxu1 %v796_v14  ;;  %v236_v29 = vld [vmem:[%s883_s11 + $0x38] sm:$0xff]  ;;  %v803_v31 = vld [vmem:[%s989_s3 + $0x50] sm:$0xff]   ;;  %v806_v34 = vld [vmem:[%s989_s3 + $0x8] sm:$0xff]  }
  0x15   : > { %327 = vmatpush1.bf16.msra.mxu0 %v789_v7  ;;  %758 = vmatprep.subr.bf16.mxu1 %v797_v16  ;;  %v240_v30 = vpack.c.bf16 %v236_v29, %v235_v28  ;;  %v804_v32 = vld [vmem:[%s989_s3 + $0x10] sm:$0xff]   ;;  %v807_v35 = vld [vmem:[%s989_s3 + $0x40] sm:$0xff]  }
  0x16   : > { %328 = vmatprep.subr.bf16.mxu0 %v790_v8  ;;  %v808_v36 = vld [vmem:[%s989_s3] sm:$0xff]  }
  0x17   : > { %v249_v41 = vld [vmem:[%s988_s2] sm:$0x3] }
  0x18   : > { %766 = vmatpush3.bf16.msra.mxu1 %v798_v19  ;;  %v258_v43 = vrot.slane %v249_v41, %v257_v39  ;;  %v254_v44 = vrot.slane %v249_v41, %v253_v40  ;;  %v697_v37 = vld [vmem:[%s990_s4] ss:$0 sm:$0xff] }
  0x19   : > { %329 = vmatpush1.bf16.msra.mxu0 %v792_v9  ;;  %759 = vmatprep.subr.bf16.mxu1 %v799_v20 }
  0x1a   : > { %716 = vmatprep.subr.bf16.mxu0 %v793_v6 }
  0x1c   : > { %693 = vmatmul.mubr.msk.bf16.vlgmr.msra.gmra.mxu0 %vm301_vm0, %v237_v15  ;;  %767 = vmatpush3.bf16.msra.mxu1 %v800_v22 }
  0x1d   : > { %356 = vmatprep.mubr.bf16.mxu0 %v817_v2  ;;  %717 = vmatpush3.bf16.msra.mxu0 %v794_v11 }
  0x1e   : > { %718 = vmatprep.subr.bf16.mxu0 %v795_v12  ;;  %760 = vmatprep.subr.bf16.mxu1 %v801_v23 }
  0x20   : > { %768 = vmatpush3.bf16.msra.mxu1 %v802_v24 }
  0x21   : > { %719 = vmatpush3.bf16.msra.mxu0 %v796_v14  ;;  %761 = vmatprep.subr.bf16.mxu1 %v803_v31 }
  0x22   : > { %720 = vmatprep.subr.bf16.mxu0 %v797_v16 }
  0x24   : > { %694 = vmatmul.mubr.msk.bf16.gmra.mxu0 %vm301_vm0, %v238_v21  ;;  %769 = vmatpush3.bf16.msra.mxu1 %v804_v32 }
  0x25   : > { %366 = vmatprep.mubr.bf16.mxu0 %v817_v2  ;;  %721 = vmatpush3.bf16.msra.mxu0 %v798_v19 }
  0x26   : > { %722 = vmatprep.subr.bf16.mxu0 %v799_v20  ;;  %762 = vmatprep.subr.bf16.mxu1 %v805_v33 }
  0x28   : > { %770 = vmatpush3.bf16.msra.mxu1 %v806_v34 }
  0x29   : > { %723 = vmatpush3.bf16.msra.mxu0 %v800_v22  ;;  %763 = vmatprep.subr.bf16.mxu1 %v807_v35 }
  0x2a   : > { %724 = vmatprep.subr.bf16.mxu0 %v801_v23 }
  0x2c   : > { %695 = vmatmul.mubr.msk.bf16.gmra.mxu0 %vm301_vm0, %v239_v27  ;;  %771 = vmatpush3.bf16.msra.mxu1 %v808_v36 }
  0x2d   : > { %376 = vmatprep.mubr.bf16.mxu0 %v817_v2  ;;  %725 = vmatpush3.bf16.msra.mxu0 %v802_v24 }
  0x2e   : > { %726 = vmatprep.subr.bf16.mxu0 %v803_v31 }
  0x31   : > { %727 = vmatpush3.bf16.msra.mxu0 %v804_v32 }
  0x32   : > { %728 = vmatprep.subr.bf16.mxu0 %v805_v33 }
  0x34   : > { %696 = vmatmul.mubr.msk.bf16.gmra.mxu0 %vm301_vm0, %v240_v30 }
  0x35   : > { %729 = vmatpush3.bf16.msra.mxu0 %v806_v34 }
  0x36   : > { %730 = vmatprep.subr.bf16.mxu0 %v807_v35 }
  0x39   : > { %731 = vmatpush3.bf16.msra.mxu0 %v808_v36 }
  0xdc   : > { %v348_v42 = vpop.f32.mrf.mxu0 }
  0xdd   : > { %v349_v49 = vadd.f32 %v348_v42, %v254_v44 }
  0xde   : > { %v350_v45 = vpop.f32.mrf.mxu0 }
  0xdf   : > { %v351_v47 = vadd.f32 %v350_v45, %v258_v43  ;;  %v387_v56 = vmax.f32 %v349_v49, 0.0 }
  0xe0   : > { %v352_v46 = vpop.f32.mrf.mxu0 }
  0xe1   : > { %v353_v48 = vadd.f32 %v352_v46, %v254_v44  ;;  %v388_v54 = vmax.f32 %v351_v47, 0.0 }
  0xe2   : > { %v354_v50 = vpop.f32.mrf.mxu0 }
  0xe3   : > { %v355_v51 = vadd.f32 %v354_v50, %v258_v43  ;;  %v389_v52 = vmax.f32 %v353_v48, 0.0 }
  0xe4   : > { %v358_v53 = vpop.f32.mrf.mxu0 }
  0xe5   : > { %v390_v55 = vmax.f32 %v355_v51, 0.0  ;;  %v403_v59 = vpack.c.bf16 %v389_v52, %v387_v56  ;;  %v359_v63 = vadd.f32 %v358_v53, %v254_v44 }
  0xe6   : > { %v360_v57 = vpop.f32.mrf.mxu0 }
  0xe7   : > { %v404_v58 = vpack.c.bf16 %v390_v55, %v388_v54  ;;  %v361_v61 = vadd.f32 %v360_v57, %v258_v43  ;;  %v391_v6 = vmax.f32 %v359_v63, 0.0 }
  0xe8   : > { %v362_v60 = vpop.f32.mrf.mxu0 }
  0xe9   : > { %v363_v62 = vadd.f32 %v362_v60, %v254_v44  ;;  %578 = vmatprep.mubr.bf16.mxu0 %v404_v58  ;;  %v392_v4 = vmax.f32 %v361_v61, 0.0 }
  0xea   : > { %v364_v0 = vpop.f32.mrf.mxu0  ;;  %579 = vmatmul.mubr.bf16.vlgmr.msra.gmra.mxu0 %v403_v59 }
  0xeb   : > { %v365_v1 = vadd.f32 %v364_v0, %v258_v43  ;;  %v393_v2 = vmax.f32 %v363_v62, 0.0 }
  0xec   : > { %v368_v3 = vpop.f32.mrf.mxu0 }
  0xed   : > { %v394_v5 = vmax.f32 %v365_v1, 0.0  ;;  %v405_v9 = vpack.c.bf16 %v393_v2, %v391_v6  ;;  %v369_v13 = vadd.f32 %v368_v3, %v254_v44 }
  0xee   : > { %v370_v7 = vpop.f32.mrf.mxu0 }
  0xef   : > { %v406_v8 = vpack.c.bf16 %v394_v5, %v392_v4  ;;  %v371_v11 = vadd.f32 %v370_v7, %v258_v43  ;;  %v395_v20 = vmax.f32 %v369_v13, 0.0 }
  0xf0   : > { %v372_v10 = vpop.f32.mrf.mxu0 }
  0xf1   : > { %v373_v12 = vadd.f32 %v372_v10, %v254_v44  ;;  %586 = vmatprep.mubr.bf16.mxu1 %v406_v8  ;;  %v396_v18 = vmax.f32 %v371_v11, 0.0 }
  0xf2   : > { %v374_v14 = vpop.f32.mrf.mxu0  ;;  %587 = vmatmul.mubr.bf16.vlgmr.msra.gmra.mxu1 %v405_v9 }
  0xf3   : > { %v375_v15 = vadd.f32 %v374_v14, %v258_v43  ;;  %v397_v16 = vmax.f32 %v373_v12, 0.0 }
  0xf4   : > { %v378_v17 = vpop.f32.mrf.mxu0 }
  0xf5   : > { %v398_v19 = vmax.f32 %v375_v15, 0.0  ;;  %v407_v23 = vpack.c.bf16 %v397_v16, %v395_v20  ;;  %v379_v27 = vadd.f32 %v378_v17, %v254_v44 }
  0xf6   : > { %v380_v21 = vpop.f32.mrf.mxu0 }
  0xf7   : > { %v408_v22 = vpack.c.bf16 %v398_v19, %v396_v18  ;;  %v381_v25 = vadd.f32 %v380_v21, %v258_v43  ;;  %v399_v33 = vmax.f32 %v379_v27, 0.0 }
  0xf8   : > { %v382_v24 = vpop.f32.mrf.mxu0 }
  0xf9   : > { %v383_v26 = vadd.f32 %v382_v24, %v254_v44  ;;  %594 = vmatprep.mubr.bf16.mxu1 %v408_v22  ;;  %v400_v31 = vmax.f32 %v381_v25, 0.0 }
  0xfa   : > { %v384_v28 = vpop.f32.mrf.mxu0  ;;  %595 = vmatmul.mubr.bf16.gmra.mxu1 %v407_v23 }
  0xfb   : > { %v385_v29 = vadd.f32 %v384_v28, %v258_v43  ;;  %v401_v30 = vmax.f32 %v383_v26, 0.0 }
  0xfd   : > { %v402_v32 = vmax.f32 %v385_v29, 0.0  ;;  %v409_v35 = vpack.c.bf16 %v401_v30, %v399_v33 }
  0xff   : > { %v410_v34 = vpack.c.bf16 %v402_v32, %v400_v31 }
 0x101   : > { %602 = vmatprep.mubr.bf16.mxu1 %v410_v34 }
 0x102   : > { %603 = vmatmul.mubr.bf16.gmra.mxu1 %v409_v35 }
 0x1aa   : > { %v732_v36 = vpop.f32.mrf.mxu0 }
 0x1ac   : > { %v733_v38 = vpop.f32.mrf.mxu0 }
 0x1ad   : > { %v734_v39 = vadd.f32 %v733_v38, %v732_v36 }
 0x1ae   : > { %v735_v40 = vpop.f32.mrf.mxu0 }
 0x1af   : > { %v581_v41 = vadd.f32 %v734_v39, %v697_v37 }
 0x1b0   : > { %v736_v42 = vpop.f32.mrf.mxu0 }
 0x1b1   : > { %612 = vst.msk [vmem:[%s965_s10] sm:$0xff] %vm611_vm1, %v581_v41  ;;  %v737_v43 = vadd.f32 %v736_v42, %v735_v40 }
 0x1b2   : > { %v738_v44 = vpop.f32.mrf.mxu1 }
 0x1b3   : > { %v584_v45 = vadd.f32 %v737_v43, %v697_v37 }
 0x1b4   : > { %v739_v46 = vpop.f32.mrf.mxu1 }
 0x1b5   : > { %613 = vst.msk [vmem:[%s965_s10 + $0x8] sm:$0xff] %vm611_vm1, %v584_v45  ;;  %v740_v47 = vadd.f32 %v739_v46, %v738_v44 }
 0x1b6   : > { %v741_v48 = vpop.f32.mrf.mxu1 }
 0x1b7   : > { %v589_v49 = vadd.f32 %v740_v47, %v697_v37 }
 0x1b8   : > { %v742_v50 = vpop.f32.mrf.mxu1 }
 0x1b9   : > { %614 = vst.msk [vmem:[%s965_s10 + $0x10] sm:$0xff] %vm611_vm1, %v589_v49  ;;  %v743_v51 = vadd.f32 %v742_v50, %v741_v48 }
 0x1ba   : > { %v744_v52 = vpop.f32.mrf.mxu1 }
 0x1bb   : > { %v592_v53 = vadd.f32 %v743_v51, %v697_v37 }
 0x1bc   : > { %v745_v54 = vpop.f32.mrf.mxu1 }
 0x1bd   : > { %615 = vst.msk [vmem:[%s965_s10 + $0x18] sm:$0xff] %vm611_vm1, %v592_v53  ;;  %v746_v55 = vadd.f32 %v745_v54, %v744_v52 }
 0x1be   : > { %v747_v56 = vpop.f32.mrf.mxu1 }
 0x1bf   : > { %v597_v57 = vadd.f32 %v746_v55, %v697_v37 }
 0x1c0   : > { %v748_v58 = vpop.f32.mrf.mxu1 }
 0x1c1   : > { %616 = vst.msk [vmem:[%s965_s10 + $0x20] sm:$0xff] %vm611_vm1, %v597_v57  ;;  %v749_v59 = vadd.f32 %v748_v58, %v747_v56 }
 0x1c2   : > { %v750_v60 = vpop.f32.mrf.mxu1 }
 0x1c3   : > { %v600_v61 = vadd.f32 %v749_v59, %v697_v37 }
 0x1c4   : > { %v751_v62 = vpop.f32.mrf.mxu1 }
 0x1c5   : > { %617 = vst.msk [vmem:[%s965_s10 + $0x28] sm:$0xff] %vm611_vm1, %v600_v61  ;;  %v752_v63 = vadd.f32 %v751_v62, %v750_v60 }
 0x1c6   : > { %v753_v0 = vpop.f32.mrf.mxu1 }
 0x1c7   : > { %v605_v1 = vadd.f32 %v752_v63, %v697_v37 }
 0x1c8   : > { %v754_v2 = vpop.f32.mrf.mxu1 }
 0x1c9   : > { %618 = vst.msk [vmem:[%s965_s10 + $0x30] sm:$0xff] %vm611_vm1, %v605_v1  ;;  %v755_v3 = vadd.f32 %v754_v2, %v753_v0 }
 0x1cb   : > { %v608_v4 = vadd.f32 %v755_v3, %v697_v37 }
 0x1cd   : > { %619 = vst.msk [vmem:[%s965_s10 + $0x38] sm:$0xff] %vm611_vm1, %v608_v4 }
 0x1ce PF: > { %s15_s18 = sadd.s32 1, %s815_s18  }
 0x1cf   : > { %p12_p4 = scmp.ge.s32.totalorder %s15_s18, 6  }
 0x1d1   :  { %14 = sbr.rel (!%p12_p4) target bundleno = 1 (0x1), region = 70 }

// kernel: tpu_custom_call.1
= control target key start
LH: loop header
LB: loop body
LE: loop exit
PB: predicated region body
PF: predicated region fallthrough
CT: control target
= control target key end

     0   :  { %s848_s18 = smov 0   ;;  %s986_s0 = inlined_call_operand.vmem [shape: f32[256,64], index: 0, kind: input, shape index: {}]   ;;  %s987_s1 = inlined_call_operand.vmem [shape: bf16[64,256], index: 1, kind: input, shape index: {}]   ;;  %s988_s2 = inlined_call_operand.vmem [shape: f32[1,256], index: 2, kind: input, shape index: {}]   ;;  %s989_s3 = inlined_call_operand.vmem [shape: bf16[256,10], index: 3, kind: input, shape index: {}]   ;;  %s990_s4 = inlined_call_operand.vmem [shape: f32[1,10], index: 4, kind: input, shape index: {}]   ;;  %s991_s5 = inlined_call_operand.vmem [shape: f32[256,10], index: 5, kind: output, shape index: {}]  }
   0x1 LB: > { %s676_s19 = sadd.s32 4294967295, %s815_s18   ;;  %p680_p0 = scmp.ge.s32.totalorder %s815_s18, 1  ;;  %s815_s18 = sphi %s848_s18, %s15_s18  }
   0x2   : > { %p188_p1 = scmp.lt.s32.totalorder %s815_s18, 5 }
   0x4   : > { %p189_p2 = pnand %p680_p0, %p188_p1 }
   0x5   : > { %s681_s22 = sshll.u32 (!%p189_p2), %s676_s19, 3 }
   0x6   : > { %192 = sbr.rel (%p189_p2) target bundleno = 462 (0x1ce), region = 40  ;;  %p217_p3 = scmp.lt.s32.totalorder (!%p189_p2), %s681_s22, 31 }
   0xb   : > { %v781_v0 = vld [vmem:[%s987_s1 + $0x34] ss:$8 sps:$4 sm:$0xff]   ;;  %v783_v1 = vld [vmem:[%s987_s1 + $0x30] ss:$8 sps:$4 sm:$0xff]   ;;  %v817_v2 = vmov 0   ;;  %s993_s22 = smov (!%p217_p3, %s681_s22), 31  ;;  %v251_v37 = vlaneseq }
   0xc   : > { %346 = vmatprep.mubr.bf16.mxu0 %v817_v2  ;;  %322 = vmatprep.subr.bf16.mxu0 %v781_v0  ;;  %v784_v3 = vld [vmem:[%s987_s1 + $0x24] ss:$8 sps:$4 sm:$0xff]   ;;  %v786_v4 = vld [vmem:[%s987_s1 + $0x20] ss:$8 sps:$4 sm:$0xff]   ;;  %v787_v5 = vld [vmem:[%s987_s1 + $0x14] ss:$8 sps:$4 sm:$0xff]  }
   0xd   : > { %323 = vmatpush1.bf16.msra.mxu0 %v783_v1  ;;  %s682_s6 = sshll.u32 %s993_s22, 3  ;;  %v793_v6 = vld [vmem:[%s989_s3 + $0x78] sm:$0xff]   ;;  %v790_v8 = vld [vmem:[%s987_s1 + $0x4] ss:$8 sps:$4 sm:$0xff]   ;;  %v792_v9 = vld [vmem:[%s987_s1] ss:$8 sps:$4 sm:$0xff]  }
   0xe   : > { %324 = vmatprep.subr.bf16.mxu0 %v784_v3  ;;  %s883_s11 = scalar_lea.vmem %s986_s0, %s682_s6  ;;  %v789_v7 = vld [vmem:[%s987_s1 + $0x10] ss:$8 sps:$4 sm:$0xff]   ;;  %756 = vmatprep.subr.bf16.mxu1 %v793_v6  ;;  %v797_v16 = vld [vmem:[%s989_s3 + $0x68] sm:$0xff]   ;;  %vm301_vm0 = vcmask 523264   ;;  %v799_v20 = vld [vmem:[%s989_s3 + $0x60] sm:$0xff]   ;;  %v252_v38 = vshrl.u32 %v251_v37, 7  ;;  %s965_s10 = scalar_lea.vmem %s991_s5, %s682_s6 }
   0xf   : > { %v229_v10 = vld [vmem:[%s883_s11] sm:$0xff]  ;;  %v794_v11 = vld [vmem:[%s989_s3 + $0x38] sm:$0xff]   ;;  %v795_v12 = vld [vmem:[%s989_s3 + $0x70] sm:$0xff]   ;;  %vm611_vm1 = vcmask 80896  }
  0x10   : > { %v230_v13 = vld [vmem:[%s883_s11 + $0x8] sm:$0xff]  ;;  %764 = vmatpush3.bf16.msra.mxu1 %v794_v11  ;;  %v796_v14 = vld [vmem:[%s989_s3 + $0x30] sm:$0xff]   ;;  %v232_v18 = vld [vmem:[%s883_s11 + $0x18] sm:$0xff]  ;;  %v257_v39 = vsub.s32 1, %v252_v38  ;;  %v253_v40 = vsub.s32 0, %v252_v38 }
  0x11   : > { %325 = vmatpush1.bf16.msra.mxu0 %v786_v4  ;;  %757 = vmatprep.subr.bf16.mxu1 %v795_v12  ;;  %v237_v15 = vpack.c.bf16 %v230_v13, %v229_v10  ;;  %v231_v17 = vld [vmem:[%s883_s11 + $0x10] sm:$0xff]  ;;  %v798_v19 = vld [vmem:[%s989_s3 + $0x28] sm:$0xff]   ;;  %v800_v22 = vld [vmem:[%s989_s3 + $0x20] sm:$0xff]  }
  0x12   : > { %326 = vmatprep.subr.bf16.mxu0 %v787_v5  ;;  %v238_v21 = vpack.c.bf16 %v232_v18, %v231_v17  ;;  %v801_v23 = vld [vmem:[%s989_s3 + $0x58] sm:$0xff]   ;;  %v233_v25 = vld [vmem:[%s883_s11 + $0x20] sm:$0xff]  ;;  %v234_v26 = vld [vmem:[%s883_s11 + $0x28] sm:$0xff] }
  0x13   : > { %v802_v24 = vld [vmem:[%s989_s3 + $0x18] sm:$0xff]   ;;  %v239_v27 = vpack.c.bf16 %v234_v26, %v233_v25  ;;  %v235_v28 = vld [vmem:[%s883_s11 + $0x30] sm:$0xff]  ;;  %v805_v33 = vld [vmem:[%s989_s3 + $0x48] sm:$0xff]  }
  0x14   : > { %765 = vmatpush3.bf16.msra.mxu1 %v796_v14  ;;  %v236_v29 = vld [vmem:[%s883_s11 + $0x38] sm:$0xff]  ;;  %v803_v31 = vld [vmem:[%s989_s3 + $0x50] sm:$0xff]   ;;  %v806_v34 = vld [vmem:[%s989_s3 + $0x8] sm:$0xff]  }
  0x15   : > { %327 = vmatpush1.bf16.msra.mxu0 %v789_v7  ;;  %758 = vmatprep.subr.bf16.mxu1 %v797_v16  ;;  %v240_v30 = vpack.c.bf16 %v236_v29, %v235_v28  ;;  %v804_v32 = vld [vmem:[%s989_s3 + $0x10] sm:$0xff]   ;;  %v807_v35 = vld [vmem:[%s989_s3 + $0x40] sm:$0xff]  }
  0x16   : > { %328 = vmatprep.subr.bf16.mxu0 %v790_v8  ;;  %v808_v36 = vld [vmem:[%s989_s3] sm:$0xff]  }
  0x17   : > { %v249_v41 = vld [vmem:[%s988_s2] sm:$0x3] }
  0x18   : > { %766 = vmatpush3.bf16.msra.mxu1 %v798_v19  ;;  %v258_v43 = vrot.slane %v249_v41, %v257_v39  ;;  %v254_v44 = vrot.slane %v249_v41, %v253_v40  ;;  %v697_v37 = vld [vmem:[%s990_s4] ss:$0 sm:$0xff] }
  0x19   : > { %329 = vmatpush1.bf16.msra.mxu0 %v792_v9  ;;  %759 = vmatprep.subr.bf16.mxu1 %v799_v20 }
  0x1a   : > { %716 = vmatprep.subr.bf16.mxu0 %v793_v6 }
  0x1c   : > { %693 = vmatmul.mubr.msk.bf16.vlgmr.msra.gmra.mxu0 %vm301_vm0, %v237_v15  ;;  %767 = vmatpush3.bf16.msra.mxu1 %v800_v22 }
  0x1d   : > { %356 = vmatprep.mubr.bf16.mxu0 %v817_v2  ;;  %717 = vmatpush3.bf16.msra.mxu0 %v794_v11 }
  0x1e   : > { %718 = vmatprep.subr.bf16.mxu0 %v795_v12  ;;  %760 = vmatprep.subr.bf16.mxu1 %v801_v23 }
  0x20   : > { %768 = vmatpush3.bf16.msra.mxu1 %v802_v24 }
  0x21   : > { %719 = vmatpush3.bf16.msra.mxu0 %v796_v14  ;;  %761 = vmatprep.subr.bf16.mxu1 %v803_v31 }
  0x22   : > { %720 = vmatprep.subr.bf16.mxu0 %v797_v16 }
  0x24   : > { %694 = vmatmul.mubr.msk.bf16.gmra.mxu0 %vm301_vm0, %v238_v21  ;;  %769 = vmatpush3.bf16.msra.mxu1 %v804_v32 }
  0x25   : > { %366 = vmatprep.mubr.bf16.mxu0 %v817_v2  ;;  %721 = vmatpush3.bf16.msra.mxu0 %v798_v19 }
  0x26   : > { %722 = vmatprep.subr.bf16.mxu0 %v799_v20  ;;  %762 = vmatprep.subr.bf16.mxu1 %v805_v33 }
  0x28   : > { %770 = vmatpush3.bf16.msra.mxu1 %v806_v34 }
  0x29   : > { %723 = vmatpush3.bf16.msra.mxu0 %v800_v22  ;;  %763 = vmatprep.subr.bf16.mxu1 %v807_v35 }
  0x2a   : > { %724 = vmatprep.subr.bf16.mxu0 %v801_v23 }
  0x2c   : > { %695 = vmatmul.mubr.msk.bf16.gmra.mxu0 %vm301_vm0, %v239_v27  ;;  %771 = vmatpush3.bf16.msra.mxu1 %v808_v36 }
  0x2d   : > { %376 = vmatprep.mubr.bf16.mxu0 %v817_v2  ;;  %725 = vmatpush3.bf16.msra.mxu0 %v802_v24 }
  0x2e   : > { %726 = vmatprep.subr.bf16.mxu0 %v803_v31 }
  0x31   : > { %727 = vmatpush3.bf16.msra.mxu0 %v804_v32 }
  0x32   : > { %728 = vmatprep.subr.bf16.mxu0 %v805_v33 }
  0x34   : > { %696 = vmatmul.mubr.msk.bf16.gmra.mxu0 %vm301_vm0, %v240_v30 }
  0x35   : > { %729 = vmatpush3.bf16.msra.mxu0 %v806_v34 }
  0x36   : > { %730 = vmatprep.subr.bf16.mxu0 %v807_v35 }
  0x39   : > { %731 = vmatpush3.bf16.msra.mxu0 %v808_v36 }
  0xdc   : > { %v348_v42 = vpop.f32.mrf.mxu0 }
  0xdd   : > { %v349_v49 = vadd.f32 %v348_v42, %v254_v44 }
  0xde   : > { %v350_v45 = vpop.f32.mrf.mxu0 }
  0xdf   : > { %v351_v47 = vadd.f32 %v350_v45, %v258_v43  ;;  %v387_v56 = vmax.f32 %v349_v49, 0.0 }
  0xe0   : > { %v352_v46 = vpop.f32.mrf.mxu0 }
  0xe1   : > { %v353_v48 = vadd.f32 %v352_v46, %v254_v44  ;;  %v388_v54 = vmax.f32 %v351_v47, 0.0 }
  0xe2   : > { %v354_v50 = vpop.f32.mrf.mxu0 }
  0xe3   : > { %v355_v51 = vadd.f32 %v354_v50, %v258_v43  ;;  %v389_v52 = vmax.f32 %v353_v48, 0.0 }
  0xe4   : > { %v358_v53 = vpop.f32.mrf.mxu0 }
  0xe5   : > { %v390_v55 = vmax.f32 %v355_v51, 0.0  ;;  %v403_v59 = vpack.c.bf16 %v389_v52, %v387_v56  ;;  %v359_v63 = vadd.f32 %v358_v53, %v254_v44 }
  0xe6   : > { %v360_v57 = vpop.f32.mrf.mxu0 }
  0xe7   : > { %v404_v58 = vpack.c.bf16 %v390_v55, %v388_v54  ;;  %v361_v61 = vadd.f32 %v360_v57, %v258_v43  ;;  %v391_v6 = vmax.f32 %v359_v63, 0.0 }
  0xe8   : > { %v362_v60 = vpop.f32.mrf.mxu0 }
  0xe9   : > { %v363_v62 = vadd.f32 %v362_v60, %v254_v44  ;;  %578 = vmatprep.mubr.bf16.mxu0 %v404_v58  ;;  %v392_v4 = vmax.f32 %v361_v61, 0.0 }
  0xea   : > { %v364_v0 = vpop.f32.mrf.mxu0  ;;  %579 = vmatmul.mubr.bf16.vlgmr.msra.gmra.mxu0 %v403_v59 }
  0xeb   : > { %v365_v1 = vadd.f32 %v364_v0, %v258_v43  ;;  %v393_v2 = vmax.f32 %v363_v62, 0.0 }
  0xec   : > { %v368_v3 = vpop.f32.mrf.mxu0 }
  0xed   : > { %v394_v5 = vmax.f32 %v365_v1, 0.0  ;;  %v405_v9 = vpack.c.bf16 %v393_v2, %v391_v6  ;;  %v369_v13 = vadd.f32 %v368_v3, %v254_v44 }
  0xee   : > { %v370_v7 = vpop.f32.mrf.mxu0 }
  0xef   : > { %v406_v8 = vpack.c.bf16 %v394_v5, %v392_v4  ;;  %v371_v11 = vadd.f32 %v370_v7, %v258_v43  ;;  %v395_v20 = vmax.f32 %v369_v13, 0.0 }
  0xf0   : > { %v372_v10 = vpop.f32.mrf.mxu0 }
  0xf1   : > { %v373_v12 = vadd.f32 %v372_v10, %v254_v44  ;;  %586 = vmatprep.mubr.bf16.mxu1 %v406_v8  ;;  %v396_v18 = vmax.f32 %v371_v11, 0.0 }
  0xf2   : > { %v374_v14 = vpop.f32.mrf.mxu0  ;;  %587 = vmatmul.mubr.bf16.vlgmr.msra.gmra.mxu1 %v405_v9 }
  0xf3   : > { %v375_v15 = vadd.f32 %v374_v14, %v258_v43  ;;  %v397_v16 = vmax.f32 %v373_v12, 0.0 }
  0xf4   : > { %v378_v17 = vpop.f32.mrf.mxu0 }
  0xf5   : > { %v398_v19 = vmax.f32 %v375_v15, 0.0  ;;  %v407_v23 = vpack.c.bf16 %v397_v16, %v395_v20  ;;  %v379_v27 = vadd.f32 %v378_v17, %v254_v44 }
  0xf6   : > { %v380_v21 = vpop.f32.mrf.mxu0 }
  0xf7   : > { %v408_v22 = vpack.c.bf16 %v398_v19, %v396_v18  ;;  %v381_v25 = vadd.f32 %v380_v21, %v258_v43  ;;  %v399_v33 = vmax.f32 %v379_v27, 0.0 }
  0xf8   : > { %v382_v24 = vpop.f32.mrf.mxu0 }
  0xf9   : > { %v383_v26 = vadd.f32 %v382_v24, %v254_v44  ;;  %594 = vmatprep.mubr.bf16.mxu1 %v408_v22  ;;  %v400_v31 = vmax.f32 %v381_v25, 0.0 }
  0xfa   : > { %v384_v28 = vpop.f32.mrf.mxu0  ;;  %595 = vmatmul.mubr.bf16.gmra.mxu1 %v407_v23 }
  0xfb   : > { %v385_v29 = vadd.f32 %v384_v28, %v258_v43  ;;  %v401_v30 = vmax.f32 %v383_v26, 0.0 }
  0xfd   : > { %v402_v32 = vmax.f32 %v385_v29, 0.0  ;;  %v409_v35 = vpack.c.bf16 %v401_v30, %v399_v33 }
  0xff   : > { %v410_v34 = vpack.c.bf16 %v402_v32, %v400_v31 }
 0x101   : > { %602 = vmatprep.mubr.bf16.mxu1 %v410_v34 }
 0x102   : > { %603 = vmatmul.mubr.bf16.gmra.mxu1 %v409_v35 }
 0x1aa   : > { %v732_v36 = vpop.f32.mrf.mxu0 }
 0x1ac   : > { %v733_v38 = vpop.f32.mrf.mxu0 }
 0x1ad   : > { %v734_v39 = vadd.f32 %v733_v38, %v732_v36 }
 0x1ae   : > { %v735_v40 = vpop.f32.mrf.mxu0 }
 0x1af   : > { %v581_v41 = vadd.f32 %v734_v39, %v697_v37 }
 0x1b0   : > { %v736_v42 = vpop.f32.mrf.mxu0 }
 0x1b1   : > { %612 = vst.msk [vmem:[%s965_s10] sm:$0xff] %vm611_vm1, %v581_v41  ;;  %v737_v43 = vadd.f32 %v736_v42, %v735_v40 }
 0x1b2   : > { %v738_v44 = vpop.f32.mrf.mxu1 }
 0x1b3   : > { %v584_v45 = vadd.f32 %v737_v43, %v697_v37 }
 0x1b4   : > { %v739_v46 = vpop.f32.mrf.mxu1 }
 0x1b5   : > { %613 = vst.msk [vmem:[%s965_s10 + $0x8] sm:$0xff] %vm611_vm1, %v584_v45  ;;  %v740_v47 = vadd.f32 %v739_v46, %v738_v44 }
 0x1b6   : > { %v741_v48 = vpop.f32.mrf.mxu1 }
 0x1b7   : > { %v589_v49 = vadd.f32 %v740_v47, %v697_v37 }
 0x1b8   : > { %v742_v50 = vpop.f32.mrf.mxu1 }
 0x1b9   : > { %614 = vst.msk [vmem:[%s965_s10 + $0x10] sm:$0xff] %vm611_vm1, %v589_v49  ;;  %v743_v51 = vadd.f32 %v742_v50, %v741_v48 }
 0x1ba   : > { %v744_v52 = vpop.f32.mrf.mxu1 }
 0x1bb   : > { %v592_v53 = vadd.f32 %v743_v51, %v697_v37 }
 0x1bc   : > { %v745_v54 = vpop.f32.mrf.mxu1 }
 0x1bd   : > { %615 = vst.msk [vmem:[%s965_s10 + $0x18] sm:$0xff] %vm611_vm1, %v592_v53  ;;  %v746_v55 = vadd.f32 %v745_v54, %v744_v52 }
 0x1be   : > { %v747_v56 = vpop.f32.mrf.mxu1 }
 0x1bf   : > { %v597_v57 = vadd.f32 %v746_v55, %v697_v37 }
 0x1c0   : > { %v748_v58 = vpop.f32.mrf.mxu1 }
 0x1c1   : > { %616 = vst.msk [vmem:[%s965_s10 + $0x20] sm:$0xff] %vm611_vm1, %v597_v57  ;;  %v749_v59 = vadd.f32 %v748_v58, %v747_v56 }
 0x1c2   : > { %v750_v60 = vpop.f32.mrf.mxu1 }
 0x1c3   : > { %v600_v61 = vadd.f32 %v749_v59, %v697_v37 }
 0x1c4   : > { %v751_v62 = vpop.f32.mrf.mxu1 }
 0x1c5   : > { %617 = vst.msk [vmem:[%s965_s10 + $0x28] sm:$0xff] %vm611_vm1, %v600_v61  ;;  %v752_v63 = vadd.f32 %v751_v62, %v750_v60 }
 0x1c6   : > { %v753_v0 = vpop.f32.mrf.mxu1 }
 0x1c7   : > { %v605_v1 = vadd.f32 %v752_v63, %v697_v37 }
 0x1c8   : > { %v754_v2 = vpop.f32.mrf.mxu1 }
 0x1c9   : > { %618 = vst.msk [vmem:[%s965_s10 + $0x30] sm:$0xff] %vm611_vm1, %v605_v1  ;;  %v755_v3 = vadd.f32 %v754_v2, %v753_v0 }
 0x1cb   : > { %v608_v4 = vadd.f32 %v755_v3, %v697_v37 }
 0x1cd   : > { %619 = vst.msk [vmem:[%s965_s10 + $0x38] sm:$0xff] %vm611_vm1, %v608_v4 }
 0x1ce PF: > { %s15_s18 = sadd.s32 1, %s815_s18  }
 0x1cf   : > { %p12_p4 = scmp.ge.s32.totalorder %s15_s18, 6  }
 0x1d1   :  { %14 = sbr.rel (!%p12_p4) target bundleno = 1 (0x1), region = 70 }

</bundles_post_ra>
